<compile_context>
chip_gen: v5e
topology: v5e:2x2
jax: 0.10.0
libtpu: 0.0.40
codegen_flags: <defaults>
</compile_context>

<pallas_src>
import jax
import jax.numpy as jnp
from jax.experimental import pallas as pl
from jax.experimental.pallas import tpu as pltpu

# ~24 MiB for the double-buffered tile footprint (2x inputs + 2x output),
# well inside v7x's 64 MiB physical VMEM.
_DEFAULT_TILE_BUDGET_BYTES = 24 * 1024 * 1024
# Explicit scoped-VMEM limit (default scoped limit is 16/32 MiB depending on
# generation); 48 MiB leaves headroom below v7x's 64 MiB physical VMEM.
_VMEM_LIMIT_BYTES = 48 * 1024 * 1024


def _sublane_align(dtype):
    """Native sublane pack: 8 rows for 32-bit, 16 for bf16, 32 for int8."""
    itemsize = jnp.dtype(dtype).itemsize
    return max(8, 8 * (4 // max(1, itemsize)))


def _make_concat_kernel(widths, axis):
    """Kernel: copy each input block into its static slice of the output block."""
    offsets = []
    off = 0
    for w in widths:
        offsets.append(off)
        off += w

    def kernel(*refs):
        out_ref = refs[-1]
        in_refs = refs[:-1]
        nd = len(out_ref.shape)
        ax = axis % nd
        for r, o, w in zip(in_refs, offsets, widths):
            idx = [slice(None)] * nd
            idx[ax] = slice(o, o + w)
            # Masked store if `o` is not lane-(128)/sublane-(8/16/32) aligned;
            # dense unmasked store otherwise (see module docstring).
            out_ref[tuple(idx)] = r[...]

    return kernel


def _compiler_params(n_grid_axes):
    return pltpu.CompilerParams(
        dimension_semantics=("parallel",) * n_grid_axes,
        vmem_limit_bytes=_VMEM_LIMIT_BYTES,
    )


def _concat_last_2d(mats, widths, total, tile_budget_bytes):
    """Concat 2-D views [R, w_i] along the last (lane) axis."""
    R = mats[0].shape[0]
    dtype = mats[0].dtype
    itemsize = jnp.dtype(dtype).itemsize
    align = _sublane_align(dtype)

    # 2x(sum inputs) + 2x(output) per row ~= 4 * total * itemsize bytes.
    row_bytes = 4 * total * itemsize
    tile_r = max(1, tile_budget_bytes // row_bytes)
    if tile_r < R:
        tile_r = max(align, (tile_r // align) * align)
    if tile_r >= R:
        tile_r = R  # full dim: no sublane-divisibility requirement.

    grid = (pl.cdiv(R, tile_r),)
    in_specs = [pl.BlockSpec((tile_r, w), lambda i: (i, 0)) for w in widths]
    out_spec = pl.BlockSpec((tile_r, total), lambda i: (i, 0))

    return pl.pallas_call(
        _make_concat_kernel(widths, axis=-1),
        out_shape=jax.ShapeDtypeStruct((R, total), dtype),
        grid=grid,
        in_specs=in_specs,
        out_specs=out_spec,
        compiler_params=_compiler_params(1),
    )(*mats)


def _concat_mid_3d(cubes, sizes, s_total, tile_budget_bytes):
    """Concat 3-D views [pre, s_i, post] along the middle axis."""
    pre = cubes[0].shape[0]
    post = cubes[0].shape[2]
    dtype = cubes[0].dtype
    itemsize = jnp.dtype(dtype).itemsize

    # Footprint per grid step ~= 4 * tile_p * s_total * tile_q * itemsize.
    full_post_row = 4 * s_total * post * itemsize
    if full_post_row <= tile_budget_bytes:
        tile_q = post                      # keep full lane extent (dense stores)
        tile_p = min(pre, max(1, tile_budget_bytes // full_post_row))
    else:
        tile_p = 1
        lanes = max(1, tile_budget_bytes // (4 * s_total * itemsize))
        tile_q = max(128, (lanes // 128) * 128)
        if tile_q >= post:
            tile_q = post

    grid = (pl.cdiv(pre, tile_p), pl.cdiv(post, tile_q))
    in_specs = [
        pl.BlockSpec((tile_p, s, tile_q), lambda i, j: (i, 0, j)) for s in sizes
    ]
    out_spec = pl.BlockSpec((tile_p, s_total, tile_q), lambda i, j: (i, 0, j))

    return pl.pallas_call(
        _make_concat_kernel(sizes, axis=1),
        out_shape=jax.ShapeDtypeStruct((pre, s_total, post), dtype),
        grid=grid,
        in_specs=in_specs,
        out_specs=out_spec,
        compiler_params=_compiler_params(2),
    )(*cubes)


def pallas_concat(tensors, dim=-1, *, tile_budget_bytes=_DEFAULT_TILE_BUDGET_BYTES):
    """jnp.concatenate(tensors, axis=dim) implemented with a Pallas TPU kernel."""
    tensors = list(tensors)
    ndim = tensors[0].ndim
    axis = dim % ndim

    # Match torch.cat dtype-promotion semantics.
    out_dtype = jnp.result_type(*tensors)
    tensors = [t if t.dtype == out_dtype else t.astype(out_dtype) for t in tensors]

    nonempty = [t for t in tensors if t.shape[axis] > 0]
    if not nonempty:
        return jnp.concatenate(tensors, axis=axis)
    if len(nonempty) == 1:
        return nonempty[0]
    tensors = nonempty

    shapes = [t.shape for t in tensors]
    sizes = [s[axis] for s in shapes]
    total = sum(sizes)
    out_shape = shapes[0][:axis] + (total,) + shapes[0][axis + 1:]
    if any(d == 0 for d in out_shape):
        return jnp.concatenate(tensors, axis=axis)

    if axis == ndim - 1:
        # --- concat along the minor (lane) axis: 2-D [R, w_i] view ---------
        R = 1
        for d in shapes[0][:-1]:
            R *= d
        mats = [t.reshape(R, t.shape[-1]) for t in tensors]   # free reshape
        out2d = _concat_last_2d(mats, sizes, total, tile_budget_bytes)
        return out2d.reshape(out_shape)
    else:
        # --- concat along a leading/middle axis: 3-D [pre, s_i, post] view -
        pre = 1
        for d in shapes[0][:axis]:
            pre *= d
        post = 1
        for d in shapes[0][axis + 1:]:
            post *= d
        cubes = [t.reshape(pre, t.shape[axis], post) for t in tensors]  # free
        out3d = _concat_mid_3d(cubes, sizes, total, tile_budget_bytes)
        return out3d.reshape(out_shape)


class Concat:
    """JAX/Pallas port of the PyTorch `Concat` module.

    Args:
        dim (int): dimension to concatenate along (default -1).
        keys (list | None): if None, __call__ takes a list/tuple of arrays;
            otherwise __call__ takes a dict and concatenates x[k] for k in keys.
    """

    def __init__(self, dim=-1, keys=None):
        self.dim = dim
        self.keys = keys

    def __call__(self, x):
        if self.keys is None:
            tensors = list(x)
        else:
            tensors = [x[k] for k in self.keys]
        return pallas_concat(tensors, dim=self.dim)


if __name__ == "__main__":
    key = jax.random.PRNGKey(0)
    k1, k2, k3 = jax.random.split(key, 3)

    # 1) list input, concat along the last (hidden) axis.
    a = jax.random.normal(k1, (2, 8, 32), dtype=jnp.float32)
    b = jax.random.normal(k2, (2, 8, 16), dtype=jnp.float32)
    c = jax.random.normal(k3, (2, 8, 64), dtype=jnp.float32)
    out1 = jax.block_until_ready(Concat(dim=-1)([a, b, c]))
    ref1 = jnp.concatenate([a, b, c], axis=-1)
    assert out1.shape == (2, 8, 112)
    assert jnp.array_equal(out1, ref1)

    # 2) dict input ordered by keys, concat along the sequence axis (dim=1),
    #    handled directly on the middle axis (no moveaxis round-trip).
    d = jax.random.normal(k1, (2, 4, 32), dtype=jnp.float32)
    e = jax.random.normal(k2, (2, 8, 32), dtype=jnp.float32)
    out2 = jax.block_until_ready(
        Concat(dim=1, keys=["first", "second"])({"second": e, "first": d}))
    ref2 = jnp.concatenate([d, e], axis=1)
    assert out2.shape == (2, 12, 32)
    assert jnp.array_equal(out2, ref2)

    # 3) force a multi-step pipelined grid on the last-axis path (small tile
    #    budget -> 8-row tiles, partial final block).
    f = jax.random.normal(k1, (60, 256), dtype=jnp.float32)
    g = jax.random.normal(k2, (60, 128), dtype=jnp.float32)
    out3 = jax.block_until_ready(
        pallas_concat([f, g], dim=-1, tile_budget_bytes=64 * 1024))
    ref3 = jnp.concatenate([f, g], axis=-1)
    assert out3.shape == (60, 384)
    assert jnp.array_equal(out3, ref3)

    # 4) concat along dim=0 with a forced lane-tiled (post) grid.
    h1 = jax.random.normal(k1, (6, 8, 128), dtype=jnp.float32)
    h2 = jax.random.normal(k2, (10, 8, 128), dtype=jnp.float32)
    out4 = jax.block_until_ready(
        pallas_concat([h1, h2], dim=0, tile_budget_bytes=64 * 1024))
    ref4 = jnp.concatenate([h1, h2], axis=0)
    assert out4.shape == (16, 8, 128)
    assert jnp.array_equal(out4, ref4)

    # 5) bf16 sanity check (sublane packing path).
    j1 = jax.random.normal(k1, (2, 16, 48)).astype(jnp.bfloat16)
    j2 = jax.random.normal(k2, (2, 16, 80)).astype(jnp.bfloat16)
    out5 = jax.block_until_ready(Concat(dim=-1)([j1, j2]))
    ref5 = jnp.concatenate([j1, j2], axis=-1)
    assert out5.shape == (2, 16, 128)
    assert jnp.array_equal(out5, ref5)

    print("KERNEL_OK")
</pallas_src>

<mosaic_0001>
module attributes {stable_mosaic.version = 11 : i64} {
  func.func @kernel(%arg0: i32, %arg1: memref<16x32xf32, #tpu.memory_space<vmem>>, %arg2: memref<16x16xf32, #tpu.memory_space<vmem>>, %arg3: memref<16x64xf32, #tpu.memory_space<vmem>>, %arg4: memref<16x112xf32, #tpu.memory_space<vmem>>) attributes {dimension_semantics = [#tpu.dimension_semantics<parallel>], iteration_bounds = array<i64: 1>, scalar_prefetch = 0 : i64, scratch_operands = 0 : i64, tpu.core_type = #tpu.core_type<tc>, window_params = [{transform_indices = @transform_0, window_bounds = array<i64: 16, 32>}, {transform_indices = @transform_1, window_bounds = array<i64: 16, 16>}, {transform_indices = @transform_2, window_bounds = array<i64: 16, 64>}, {transform_indices = @transform_3, window_bounds = array<i64: 16, 112>}]} {
    %c0 = arith.constant 0 : index
    %c0_0 = arith.constant 0 : index
    %0 = vector.load %arg1[%c0, %c0_0] : memref<16x32xf32, #tpu.memory_space<vmem>>, vector<16x32xf32>
    %c0_1 = arith.constant 0 : index
    %c0_2 = arith.constant 0 : index
    %1 = vector.load %arg4[%c0_1, %c0_2] : memref<16x112xf32, #tpu.memory_space<vmem>>, vector<16x32xf32>
    tpu.vector_store %arg4[%c0_1, %c0_2], %0 {strides = array<i32>} : memref<16x112xf32, #tpu.memory_space<vmem>>, vector<16x32xf32>,
    %c0_3 = arith.constant 0 : index
    %c0_4 = arith.constant 0 : index
    %2 = vector.load %arg2[%c0_3, %c0_4] : memref<16x16xf32, #tpu.memory_space<vmem>>, vector<16x16xf32>
    %c0_5 = arith.constant 0 : index
    %c32 = arith.constant 32 : index
    %3 = vector.load %arg4[%c0_5, %c32] : memref<16x112xf32, #tpu.memory_space<vmem>>, vector<16x16xf32>
    tpu.vector_store %arg4[%c0_5, %c32], %2 {strides = array<i32>} : memref<16x112xf32, #tpu.memory_space<vmem>>, vector<16x16xf32>,
    %c0_6 = arith.constant 0 : index
    %c0_7 = arith.constant 0 : index
    %4 = vector.load %arg3[%c0_6, %c0_7] : memref<16x64xf32, #tpu.memory_space<vmem>>, vector<16x64xf32>
    %c0_8 = arith.constant 0 : index
    %c48 = arith.constant 48 : index
    %5 = vector.load %arg4[%c0_8, %c48] : memref<16x112xf32, #tpu.memory_space<vmem>>, vector<16x64xf32>
    tpu.vector_store %arg4[%c0_8, %c48], %4 {strides = array<i32>} : memref<16x112xf32, #tpu.memory_space<vmem>>, vector<16x64xf32>,
    return
  }
  func.func @transform_0(%arg0: i32) -> (i32, i32) {
    %c0_i32 = arith.constant 0 : i32
    %c0_i32_0 = arith.constant 0 : i32
    return %arg0, %c0_i32 : i32, i32
  }
  func.func @transform_1(%arg0: i32) -> (i32, i32) {
    %c0_i32 = arith.constant 0 : i32
    %c0_i32_0 = arith.constant 0 : i32
    return %arg0, %c0_i32 : i32, i32
  }
  func.func @transform_2(%arg0: i32) -> (i32, i32) {
    %c0_i32 = arith.constant 0 : i32
    %c0_i32_0 = arith.constant 0 : i32
    return %arg0, %c0_i32 : i32, i32
  }
  func.func @transform_3(%arg0: i32) -> (i32, i32) {
    %c0_i32 = arith.constant 0 : i32
    %c0_i32_0 = arith.constant 0 : i32
    return %arg0, %c0_i32 : i32, i32
  }
}

</mosaic_0001>

<bundles_post_ra>
// kernel: tpu_custom_call.1
= control target key start
LH: loop header
LB: loop body
LE: loop exit
PB: predicated region body
PF: predicated region fallthrough
CT: control target
= control target key end

     0   :  { %8 = vsyncpa [#allocation3], 0  ;;  %s275_s0 = inlined_call_operand.hbm [shape: f32[16,32], index: 0, kind: input, shape index: {}]   ;;  %s276_s1 = inlined_call_operand.hbm [shape: f32[16,16], index: 1, kind: input, shape index: {}]   ;;  %s277_s2 = inlined_call_operand.hbm [shape: f32[16,64], index: 2, kind: input, shape index: {}]   ;;  %s278_s3 = inlined_call_operand.hbm [shape: f32[16,112], index: 3, kind: output, shape index: {}]  }
   0x1   :  { %9 = vsyncpa [#allocation6], 0 }
   0x2   :  { %10 = vsyncpa [#allocation4], 0  ;;  %s28_s14 = sshll.u32 %s276_s1, 4  ;;  %s223_s15 = smov [#allocation5]   ;;  %s29_s14 = int_to_ptr.hbm [resolvable:$true] %s28_s14 }
   0x3   :  { %s30_s16 = sshll.u32 %s223_s15, 4  ;;  %s15_s19 = sshll.u32 %s275_s0, 4  ;;  %s31_s16 = int_to_ptr.vmem [resolvable:$true] %s30_s16  ;;  %s16_s19 = int_to_ptr.hbm [resolvable:$true] %s15_s19 }
   0x4   :  { %s224_s20 = smov 128   ;;  %s225_s21 = smov 8  }
   0x5   :  { %36 = dma.hbm_to_vmem [thread:$0]  %s29_s14, 256, %s31_s16, [#allocation6], %s224_s20, %s224_s20, %s225_s21  }
   0x6   :  { %s226_s22 = smov [#allocation2]   ;;  %s41_s1 = sshll.u32 %s277_s2, 4  ;;  %s42_s1 = int_to_ptr.hbm [resolvable:$true] %s41_s1 }
   0x7   :  { %s17_s23 = sshll.u32 %s226_s22, 4  ;;  %s227_s0 = smov [#allocation7]   ;;  %s18_s23 = int_to_ptr.vmem [resolvable:$true] %s17_s23 }
   0x8   :  { %23 = dma.hbm_to_vmem [thread:$0]  %s16_s19, 256, %s18_s23, [#allocation3], %s224_s20, %s224_s20, %s225_s21  }
   0x9   :  { %s43_s26 = sshll.u32 %s227_s0, 4  ;;  %s44_s26 = int_to_ptr.vmem [resolvable:$true] %s43_s26 }
   0xa   :  { %49 = dma.hbm_to_vmem [thread:$0]  %s42_s1, 256, %s44_s26, [#allocation6], %s224_s20, %s224_s20, %s225_s21  }
   0xb   :  { %217 = dma.done.wait [#allocation3], 256  }
   0xc   :  { %218 = vsyncadd [#allocation3], 4294967040 }
   0xd   :  { %219 = dma.done.wait [#allocation6], 512  }
   0xe   :  { %220 = vsyncadd [#allocation6], 4294966784  ;;  %v67_v0 = vld [vmem:[#allocation5] sm:$0xff]  ;;  %v80_v1 = vld [vmem:[#allocation7] sm:$0xff]  ;;  %s228_s2 = smov 32   ;;  %s229_s27 = smov 48  }
   0xf   :  { %71 = vrot.lane.b32.xlu0 %v67_v0, %s228_s2  ;;  %84 = vrot.lane.b32.xlu1 %v80_v1, %s229_s27  ;;  %v68_v2 = vld [vmem:[#allocation5 + $0x8] sm:$0xff]  ;;  %v81_v3 = vld [vmem:[#allocation7 + $0x8] sm:$0xff]  ;;  %vm64_vm0 = vcmask 261120   ;;  %v62_v4 = vld [vmem:[#allocation2] sm:$0xff]  ;;  %vm77_vm1 = vcmask 392448   ;;  %vm90_vm2 = vcmask 916864  }
  0x10   :  { %65 = vst.msk [vmem:[#allocation8] sm:$0xff] %vm64_vm0, %v62_v4  ;;  %v63_v5 = vld [vmem:[#allocation2 + $0x8] sm:$0xff]  ;;  %s230_s28 = smov [#allocation8]   ;;  %s99_s5 = sshll.u32 %s278_s3, 4  ;;  %s100_s5 = int_to_ptr.hbm [resolvable:$true] %s99_s5 }
  0x11   :  { %66 = vst.msk [vmem:[#allocation8 + $0x8] sm:$0xff] %vm64_vm0, %v63_v5  ;;  %s97_s29 = sshll.u32 %s230_s28, 4  ;;  %s98_s29 = int_to_ptr.vmem [resolvable:$true] %s97_s29 }
  0x17   :  { %73 = vrot.lane.b32.xlu0 %v68_v2, %s228_s2  ;;  %86 = vrot.lane.b32.xlu1 %v81_v3, %s229_s27 }
  0x81   :  { %v72_v6 = vpop.permute.xlu0 %71  ;;  %v85_v7 = vpop.permute.xlu1 %84 }
  0x82   :  { %78 = vst.msk [vmem:[#allocation8] sm:$0xff] %vm77_vm1, %v72_v6 }
  0x83   :  { %91 = vst.msk [vmem:[#allocation8] sm:$0xff] %vm90_vm2, %v85_v7 }
  0x89   :  { %v74_v8 = vpop.permute.xlu0 %73  ;;  %v87_v9 = vpop.permute.xlu1 %86 }
  0x8a   :  { %79 = vst.msk [vmem:[#allocation8 + $0x8] sm:$0xff] %vm77_vm1, %v74_v8 }
  0x8b   :  { %92 = vst.msk [vmem:[#allocation8 + $0x8] sm:$0xff] %vm90_vm2, %v87_v9 }
  0x8c   :  { %105 = dma.vmem_to_hbm [thread:$0]  %s98_s29, 256, %s100_s5, [#allocation4], %s224_s20, %s224_s20, %s225_s21  }
  0x8d   :  { %221 = dma.done.wait [#allocation4], 256  }
  0x8e   :  { %222 = vsyncadd [#allocation4], 4294967040 }
  0x8f   :  { %110 = vsyncpa [#allocation3], 1 }
  0x90   :  { %111 = vsyncpa [#allocation6], 1 }
  0x91   :  { %112 = vsyncpa [#allocation4], 1 }

</bundles_post_ra>
